<compile_context>
chip_gen: v7x
topology: tpu7x:2x2x1
jax: 0.10.0
libtpu: 0.0.40
codegen_flags: <defaults>
</compile_context>

<pallas_src>
import jax
import jax.numpy as jnp
import numpy as np
from jax.experimental import pallas as pl
from jax.experimental.pallas import tpu as pltpu


def _gabor_kernel(params_ref, mesh_ref, o_ref):
    # params_ref: (B, 5)  f32 VMEM — rows of [freq, sigma_x, sigma_y, theta, offset]
    # mesh_ref:   (2, KP) f32 VMEM — row 0 = flattened x mesh, row 1 = y mesh
    # o_ref:      (B, KP) f32 VMEM — lane-dense flattened filters; lanes
    #             [0, K*K) hold the row-major (K, K) filter, the rest is pad.
    x = mesh_ref[0:1, :]                 # (1, KP), broadcasts over filters
    y = mesh_ref[1:2, :]                 # (1, KP)

    # Per-filter parameters as (B, 1) column vectors (lane-broadcast).
    freq = params_ref[:, 0:1]
    sx = params_ref[:, 1:2]
    sy = params_ref[:, 2:3]
    theta = params_ref[:, 3:4]
    offset = params_ref[:, 4:5]

    # Hoisted per-filter scalar math: only (B, 1)-sized div/log/trig here; the
    # (B, KP) hot path below is pure mul/add + one exp + one cos.
    two_pi = jnp.float32(2.0 * np.pi)
    ct = jnp.cos(theta)
    st = jnp.sin(theta)
    neg_half_inv_sx2 = -0.5 / (sx * sx)
    neg_half_inv_sy2 = -0.5 / (sy * sy)
    log_norm = -jnp.log(two_pi * sx * sy)   # norm folded into the exponent
    two_pi_f = two_pi * freq

    rotx = x * ct + y * st                  # (B, KP)
    roty = y * ct - x * st                  # (B, KP)
    arg = (rotx * rotx * neg_half_inv_sx2 +
           roty * roty * neg_half_inv_sy2 + log_norm)
    o_ref[...] = jnp.exp(arg) * jnp.cos(two_pi_f * rotx + offset)


def _num_tensorcores():
    # Heuristic: v7x exposes 2 TensorCores per chip; v5e/v6e have 1.
    try:
        kind = jax.devices()[0].device_kind.lower()
    except Exception:
        return 1
    return 2 if "7" in kind else 1


def _choose_block(N, KP):
    """Pick the per-step filter batch B (multiple of 8) and padded row count."""
    n_groups = pl.cdiv(N, 8)                  # 8-row sublane groups
    n8 = 8 * n_groups
    # grid=1 on single-TC chips; >=2 parallel steps on 2-TC chips (v7x).
    target_steps = 2 if (_num_tensorcores() >= 2 and n8 >= 16) else 1
    B = 8 * pl.cdiv(n_groups, target_steps)
    # Cap so the double-buffered output block stays well under the smallest
    # default scoped-VMEM limit (v5e: 16 MiB): <= ~6 MiB per output buffer.
    max_b = max(8, 8 * ((6 * 1024 * 1024) // (KP * 4 * 2 * 8)))
    B = min(B, max_b)
    n_steps = pl.cdiv(n8, B)
    return B, B * n_steps


def _make_mesh(K, KP):
    # Flattened meshgrid(indexing='ij') as a tiny host-built constant.
    w = K // 2
    grid_val = np.arange(-w, w + 1, dtype=np.float32)
    x, y = np.meshgrid(grid_val, grid_val, indexing="ij")
    mesh = np.zeros((2, KP), np.float32)
    mesh[0, :K * K] = x.reshape(-1)
    mesh[1, :K * K] = y.reshape(-1)
    return jnp.asarray(mesh)


def gabor_bank(params, kernel_size):
    """params: (N, 5) float32 rows of [freq, sigma_x, sigma_y, theta, offset].
    Returns (N, kernel_size, kernel_size) float32 Gabor filters."""
    if kernel_size % 2 != 1:
        # torch.arange(-w, w+1) yields 2w+1 grid points; even K is undefined
        # w.r.t. the PyTorch module's own meshgrid.
        raise ValueError("kernel_size must be odd")
    params = jnp.asarray(params, jnp.float32)
    N = params.shape[0]
    K = kernel_size
    KK = K * K
    KP = 128 * pl.cdiv(KK, 128)          # lane-dense padded flat width

    B, n_pad = _choose_block(N, KP)

    if n_pad != N:
        # Benign padding rows (sigma=1) so padded rows stay finite.
        pad = jnp.tile(jnp.array([[0.0, 1.0, 1.0, 0.0, 0.0]], jnp.float32),
                       (n_pad - N, 1))
        params = jnp.concatenate([params, pad], axis=0)

    mesh = _make_mesh(K, KP)

    cost = pl.CostEstimate(
        flops=12 * n_pad * KP,
        transcendentals=2 * n_pad * KP,          # exp + cos per output element
        bytes_accessed=4 * (n_pad * KP + n_pad * 5 + 2 * KP),
    )

    out_flat = pl.pallas_call(
        _gabor_kernel,
        out_shape=jax.ShapeDtypeStruct((n_pad, KP), jnp.float32),
        grid=(n_pad // B,),
        in_specs=[pl.BlockSpec((B, 5), lambda i: (i, 0)),
                  pl.BlockSpec((2, KP), lambda i: (0, 0))],
        out_specs=pl.BlockSpec((B, KP), lambda i: (i, 0)),
        compiler_params=pltpu.CompilerParams(
            dimension_semantics=("parallel",)),
        cost_estimate=cost,
    )(params, mesh)

    # Free layout plumbing in the wrapper: strip padding and unflatten.
    return out_flat[:N, :KK].reshape(N, K, K)


def gabor_kernel(freq, sigma_x, sigma_y, theta, offset, kernel_size):
    """Exact equivalent of GaborKernel(kernel_size).forward(...) -> (K, K)."""
    params = jnp.stack([jnp.asarray(freq), jnp.asarray(sigma_x),
                        jnp.asarray(sigma_y), jnp.asarray(theta),
                        jnp.asarray(offset)]).astype(jnp.float32).reshape(1, 5)
    return gabor_bank(params, kernel_size)[0]


def _gabor_ref(params_np, kernel_size):
    # NumPy (float64) reference mirroring the PyTorch forward, for verification.
    params_np = np.asarray(params_np, np.float64)
    w = kernel_size // 2
    grid_val = np.arange(-w, w + 1, dtype=np.float64)
    x, y = np.meshgrid(grid_val, grid_val, indexing="ij")
    outs = []
    for freq, sx, sy, theta, offset in params_np:
        rotx = x * np.cos(theta) + y * np.sin(theta)
        roty = -x * np.sin(theta) + y * np.cos(theta)
        g = np.exp(-0.5 * (rotx ** 2 / sx ** 2 + roty ** 2 / sy ** 2))
        g = g / (2 * np.pi * sx * sy)
        g = g * np.cos(2 * np.pi * freq * rotx + offset)
        outs.append(g)
    return np.stack(outs)


if __name__ == "__main__":
    kernel_size = 15
    key = jax.random.PRNGKey(0)

    freq = sigma_x = sigma_y = theta = offset = None
    ref = None
    # N=4: single-step grid (8 padded rows).
    # N=100: 104 padded rows -> 1 step (v5e/v6e) or 2 steps of 56 (v7x).
    for N in (4, 100):
        key, k1, k2, k3, k4, k5 = jax.random.split(key, 6)
        freq = jax.random.uniform(k1, (N,), minval=0.05, maxval=0.30)
        sigma_x = jax.random.uniform(k2, (N,), minval=1.0, maxval=4.0)
        sigma_y = jax.random.uniform(k3, (N,), minval=1.0, maxval=4.0)
        theta = jax.random.uniform(k4, (N,), minval=0.0, maxval=np.pi)
        offset = jax.random.uniform(k5, (N,), minval=0.0, maxval=2 * np.pi)
        params = jnp.stack([freq, sigma_x, sigma_y, theta, offset],
                           axis=1).astype(jnp.float32)           # (N, 5)

        out = jax.block_until_ready(gabor_bank(params, kernel_size))
        assert out.shape == (N, kernel_size, kernel_size)

        ref = _gabor_ref(np.asarray(params), kernel_size)
        np.testing.assert_allclose(np.asarray(out), ref,
                                   rtol=1e-4, atol=2e-5)

    # Single-filter API matching the PyTorch forward -> (K, K).
    single = jax.block_until_ready(
        gabor_kernel(freq[0], sigma_x[0], sigma_y[0], theta[0], offset[0],
                     kernel_size))
    assert single.shape == (kernel_size, kernel_size)
    np.testing.assert_allclose(np.asarray(single), ref[0],
                               rtol=1e-4, atol=2e-5)

    print("KERNEL_OK")
</pallas_src>

<mosaic_0001>
module attributes {stable_mosaic.version = 11 : i64} {
  func.func @_gabor_kernel(%arg0: i32, %arg1: memref<8x5xf32, #tpu.memory_space<vmem>>, %arg2: memref<2x256xf32, #tpu.memory_space<vmem>>, %arg3: memref<8x256xf32, #tpu.memory_space<vmem>>) attributes {dimension_semantics = [#tpu.dimension_semantics<parallel>], iteration_bounds = array<i64: 1>, scalar_prefetch = 0 : i64, scratch_operands = 0 : i64, tpu.core_type = #tpu.core_type<tc>, window_params = [{transform_indices = @transform_0, window_bounds = array<i64: 8, 5>}, {pipeline_mode = #tpu.pipeline_mode<synchronous>, transform_indices = @transform_1, window_bounds = array<i64: 2, 256>}, {transform_indices = @transform_2, window_bounds = array<i64: 8, 256>}]} {
    %c0 = arith.constant 0 : index
    %c0_0 = arith.constant 0 : index
    %0 = vector.load %arg2[%c0, %c0_0] : memref<2x256xf32, #tpu.memory_space<vmem>>, vector<1x256xf32>
    %c1 = arith.constant 1 : index
    %c0_1 = arith.constant 0 : index
    %1 = vector.load %arg2[%c1, %c0_1] : memref<2x256xf32, #tpu.memory_space<vmem>>, vector<1x256xf32>
    %c0_2 = arith.constant 0 : index
    %c0_3 = arith.constant 0 : index
    %2 = vector.load %arg1[%c0_2, %c0_3] : memref<8x5xf32, #tpu.memory_space<vmem>>, vector<8x1xf32>
    %c0_4 = arith.constant 0 : index
    %c1_5 = arith.constant 1 : index
    %3 = vector.load %arg1[%c0_4, %c1_5] : memref<8x5xf32, #tpu.memory_space<vmem>>, vector<8x1xf32>
    %c0_6 = arith.constant 0 : index
    %c2 = arith.constant 2 : index
    %4 = vector.load %arg1[%c0_6, %c2] : memref<8x5xf32, #tpu.memory_space<vmem>>, vector<8x1xf32>
    %c0_7 = arith.constant 0 : index
    %c3 = arith.constant 3 : index
    %5 = vector.load %arg1[%c0_7, %c3] : memref<8x5xf32, #tpu.memory_space<vmem>>, vector<8x1xf32>
    %c0_8 = arith.constant 0 : index
    %c4 = arith.constant 4 : index
    %6 = vector.load %arg1[%c0_8, %c4] : memref<8x5xf32, #tpu.memory_space<vmem>>, vector<8x1xf32>
    %7 = math.cos %5 : vector<8x1xf32>
    %8 = math.sin %5 : vector<8x1xf32>
    %9 = arith.mulf %3, %3 : vector<8x1xf32>
    %cst = arith.constant -5.000000e-01 : f32
    %10 = vector.broadcast %cst : f32 to vector<8x1xf32>
    %11 = arith.divf %10, %9 : vector<8x1xf32>
    %12 = arith.mulf %4, %4 : vector<8x1xf32>
    %cst_9 = arith.constant -5.000000e-01 : f32
    %13 = vector.broadcast %cst_9 : f32 to vector<8x1xf32>
    %14 = arith.divf %13, %12 : vector<8x1xf32>
    %cst_10 = arith.constant 6.28318548 : f32
    %15 = vector.broadcast %cst_10 : f32 to vector<8x1xf32>
    %16 = arith.mulf %15, %3 : vector<8x1xf32>
    %17 = arith.mulf %16, %4 : vector<8x1xf32>
    %18 = math.log %17 : vector<8x1xf32>
    %cst_11 = arith.constant 0.000000e+00 : f32
    %19 = vector.broadcast %cst_11 : f32 to vector<8x1xf32>
    %20 = arith.subf %19, %18 : vector<8x1xf32>
    %cst_12 = arith.constant 6.28318548 : f32
    %21 = vector.broadcast %cst_12 : f32 to vector<8x1xf32>
    %22 = arith.mulf %21, %2 : vector<8x1xf32>
    %23 = vector.broadcast %0 : vector<1x256xf32> to vector<8x256xf32>
    %24 = vector.broadcast %7 : vector<8x1xf32> to vector<8x256xf32>
    %25 = arith.mulf %23, %24 : vector<8x256xf32>
    %26 = vector.broadcast %1 : vector<1x256xf32> to vector<8x256xf32>
    %27 = vector.broadcast %8 : vector<8x1xf32> to vector<8x256xf32>
    %28 = arith.mulf %26, %27 : vector<8x256xf32>
    %29 = arith.addf %25, %28 : vector<8x256xf32>
    %30 = vector.broadcast %1 : vector<1x256xf32> to vector<8x256xf32>
    %31 = vector.broadcast %7 : vector<8x1xf32> to vector<8x256xf32>
    %32 = arith.mulf %30, %31 : vector<8x256xf32>
    %33 = vector.broadcast %0 : vector<1x256xf32> to vector<8x256xf32>
    %34 = vector.broadcast %8 : vector<8x1xf32> to vector<8x256xf32>
    %35 = arith.mulf %33, %34 : vector<8x256xf32>
    %36 = arith.subf %32, %35 : vector<8x256xf32>
    %37 = arith.mulf %29, %29 : vector<8x256xf32>
    %38 = vector.broadcast %11 : vector<8x1xf32> to vector<8x256xf32>
    %39 = arith.mulf %37, %38 : vector<8x256xf32>
    %40 = arith.mulf %36, %36 : vector<8x256xf32>
    %41 = vector.broadcast %14 : vector<8x1xf32> to vector<8x256xf32>
    %42 = arith.mulf %40, %41 : vector<8x256xf32>
    %43 = arith.addf %39, %42 : vector<8x256xf32>
    %44 = vector.broadcast %20 : vector<8x1xf32> to vector<8x256xf32>
    %45 = arith.addf %43, %44 : vector<8x256xf32>
    %46 = math.exp %45 : vector<8x256xf32>
    %47 = vector.broadcast %22 : vector<8x1xf32> to vector<8x256xf32>
    %48 = arith.mulf %47, %29 : vector<8x256xf32>
    %49 = vector.broadcast %6 : vector<8x1xf32> to vector<8x256xf32>
    %50 = arith.addf %48, %49 : vector<8x256xf32>
    %51 = math.cos %50 : vector<8x256xf32>
    %52 = arith.mulf %46, %51 : vector<8x256xf32>
    %c0_13 = arith.constant 0 : index
    %c0_14 = arith.constant 0 : index
    %53 = vector.load %arg3[%c0_13, %c0_14] : memref<8x256xf32, #tpu.memory_space<vmem>>, vector<8x256xf32>
    tpu.vector_store %arg3[%c0_13, %c0_14], %52 {strides = array<i32>} : memref<8x256xf32, #tpu.memory_space<vmem>>, vector<8x256xf32>,
    return
  }
  func.func @transform_0(%arg0: i32) -> (i32, i32) {
    %c0_i32 = arith.constant 0 : i32
    %c0_i32_0 = arith.constant 0 : i32
    return %arg0, %c0_i32 : i32, i32
  }
  func.func @transform_1(%arg0: i32) -> (i32, i32) {
    %c0_i32 = arith.constant 0 : i32
    %c0_i32_0 = arith.constant 0 : i32
    %c0_i32_1 = arith.constant 0 : i32
    return %c0_i32, %c0_i32_0 : i32, i32
  }
  func.func @transform_2(%arg0: i32) -> (i32, i32) {
    %c0_i32 = arith.constant 0 : i32
    %c0_i32_0 = arith.constant 0 : i32
    return %arg0, %c0_i32 : i32, i32
  }
}

</mosaic_0001>

<bundles_post_ra>
// kernel: tpu_custom_call.1
= control target key start
LH: loop header
LB: loop body
LE: loop exit
PB: predicated region body
PF: predicated region fallthrough
CT: control target
= control target key end

     0   :  { %7 = vsyncpa [#allocation3], 0  ;;  %s926_s0 = inlined_call_operand.hbm [shape: f32[8,5], index: 0, kind: input, shape index: {}]   ;;  %s927_s1 = inlined_call_operand.hbm [shape: f32[2,256], index: 1, kind: input, shape index: {}]   ;;  %s928_s2 = inlined_call_operand.hbm [shape: f32[8,256], index: 2, kind: output, shape index: {}]  }
   0x1   :  { %8 = vsyncpa [#allocation6], 0 }
   0x2   :  { %9 = vsyncpa [#allocation4], 0  ;;  %s715_s9 = smov [#allocation2]   ;;  %s716_s11 = smov [#allocation5]  }
   0x3   :  { %s16_s10 = sshll.u32 %s715_s9, 4  ;;  %s26_s12 = sshll.u32 %s716_s11, 4  ;;  %s17_s10 = int_to_ptr.vmem [resolvable:$true] %s16_s10  ;;  %s27_s12 = int_to_ptr.vmem [resolvable:$true] %s26_s12 }
   0x4   :  { %s643_s15 = scalar_lea.hbm %s926_s0, 128 }
   0x5   :  { %p644_p0 = scmp.ne.s32.totalorder %s926_s0, %s643_s15  ;;  %p647_p1 = scmp.lt.u32.totalorder %s643_s15, %s926_s0 }
   0x7   :  { %p649_p2 = pnand %p647_p1, %p644_p0 }
   0x9   :  { %652 = shalt.err (!%p649_p2)
}
   0xa   :  { %s653_s20 = scalar_lea.vmem %s17_s10, 128  ;;  %p658_p4 = scmp.lt.s32.totalorder %s17_s10, %s17_s10 }
   0xb   :  { %p654_p3 = scmp.ne.s32.totalorder %s17_s10, %s653_s20  ;;  %p659_p5 = scmp.lt.s32.totalorder %s653_s20, %s653_s20 }
   0xd   :  { %p660_p6 = por %p659_p5, %p658_p4 }
   0xf   :  { %p661_p7 = pnand %p660_p6, %p654_p3 }
  0x11   :  { %664 = shalt.err (!%p661_p7)
}
  0x12   :  { %19 = dma.hbm_to_vmem [thread:$0]  %s926_s0, 128, %s17_s10, [#allocation3]  }
  0x13   :  { %s665_s25 = scalar_lea.hbm %s927_s1, 64 }
  0x14   :  { %p666_p8 = scmp.ne.s32.totalorder %s927_s1, %s665_s25  ;;  %p669_p9 = scmp.lt.u32.totalorder %s665_s25, %s927_s1 }
  0x16   :  { %p671_p10 = pnand %p669_p9, %p666_p8 }
  0x18   :  { %674 = shalt.err (!%p671_p10)
}
  0x19   :  { %s675_s30 = scalar_lea.vmem %s27_s12, 64  ;;  %p680_p12 = scmp.lt.s32.totalorder %s27_s12, %s27_s12 }
  0x1a   :  { %p676_p11 = scmp.ne.s32.totalorder %s27_s12, %s675_s30  ;;  %p681_p13 = scmp.lt.s32.totalorder %s675_s30, %s675_s30 }
  0x1c   :  { %p682_p0 = por %p681_p13, %p680_p12 }
  0x1e   :  { %p683_p1 = pnand %p682_p0, %p676_p11 }
  0x20   :  { %686 = shalt.err (!%p683_p1)
}
  0x21   :  { %29 = dma.hbm_to_vmem [thread:$0]  %s927_s1, 64, %s27_s12, [#allocation6]  }
  0x22   :  { %709 = dma.done.wait [#allocation3], 128  }
  0x23   :  { %710 = vsyncadd [#allocation3], 4294967168 }
  0x24   :  { %711 = dma.done.wait [#allocation6], 64  }
  0x25   :  { %712 = vsyncadd [#allocation6], 4294967232  ;;  %v717_v0 = vmov 3   ;;  %v769_v1 = vld [vmem:[#allocation2] sm:$0xff]  ;;  %s718_s4 = smov 127   ;;  %s729_s1 = smov [#allocation7]  }
  0x26   :  { %616 = vset.pattern.permute.xlu1 %v717_v0  ;;  %615 = vset.pattern.permute.xlu0 %v717_v0  ;;  %v43_v2 = vand.u32 2139095040, %v769_v1  ;;  %v40_v4 = vand.u32 2147483647, %v769_v1  ;;  %v719_v13 = vmov 683565275   ;;  %vm42_vm7 = vcmp.lt.s32.totalorder %v769_v1, 0 }
  0x27   :  { %252 = vrot.lane.b32.xlu0 %v769_v1, %s718_s4  ;;  %v720_v15 = vmov 2475754826   ;;  %v721_v17 = vmov 2131351028   ;;  %v722_v19 = vmov 2102212464   ;;  %vm132_vm15 = vweird.f32 %v769_v1 }
  0x28   :  { %v44_v3 = vshrl.u32 %v43_v2, 23  ;;  %v47_v7 = vand.u32 8388607, %v40_v4  ;;  %v723_v21 = vmov 920167782   ;;  %s562_s5 = sshll.u32 %s729_s1, 4  ;;  %s563_s5 = int_to_ptr.vmem [resolvable:$true] %s562_s5 }
  0x29   :  { %v724_v28 = vmov 1326507024   ;;  %vm41_vm8 = vcmp.le.f32.partialorder %v40_v4, 0.7853982  ;;  %s687_s6 = scalar_lea.vmem %s563_s5, 256  ;;  %p692_p3 = scmp.lt.s32.totalorder %s563_s5, %s563_s5 }
  0x2a   :  { %v572_v5 = vadd.s32 4294967169, %v44_v3  ;;  %v48_v10 = vor.u32 8388608, %v47_v7  ;;  %p688_p2 = scmp.ne.s32.totalorder %s563_s5, %s687_s6  ;;  %p693_p4 = scmp.lt.s32.totalorder %s687_s6, %s687_s6 }
  0x2c   :  { %v50_v6 = vadd.s32 1, %v572_v5  ;;  %v88_v30 = vshll.u32 %v48_v10, 8  ;;  %p694_p5 = por %p693_p4, %p692_p3 }
  0x2e   :  { %vm51_vm0 = vcmp.gt.s32.totalorder %v50_v6, 0  ;;  %p695_p6 = pnand %p694_p5, %p688_p2 }
  0x2f   :  { %v52_v8 = vsel %vm51_vm0, %v50_v6, 0 }
  0x30   :  { %v54_v9 = vand.u32 31, %v52_v8  ;;  %v53_v11 = vshrl.u32 %v52_v8, 5 }
  0x32   :  { %v55_v12 = vsub.s32 32, %v54_v9  ;;  %v57_v14 = vshll.u32 %v719_v13, %v54_v9  ;;  %v60_v16 = vshll.u32 %v720_v15, %v54_v9  ;;  %v63_v18 = vshll.u32 %v721_v17, %v54_v9 }
  0x33   :  { %v66_v20 = vshll.u32 %v722_v19, %v54_v9  ;;  %v69_v22 = vshll.u32 %v723_v21, %v54_v9  ;;  %vm72_vm1 = vcmp.lt.s32.totalorder %v53_v11, 1  ;;  %vm75_vm2 = vcmp.lt.s32.totalorder %v53_v11, 4 }
  0x34   :  { %v56_v23 = vshrl.u32 %v719_v13, %v55_v12  ;;  %v58_v24 = vshrl.u32 %v720_v15, %v55_v12  ;;  %v61_v25 = vshrl.u32 %v721_v17, %v55_v12  ;;  %v64_v26 = vshrl.u32 %v722_v19, %v55_v12 }
  0x35   :  { %v67_v27 = vshrl.u32 %v723_v21, %v55_v12  ;;  %v70_v29 = vshrl.u32 %v724_v28, %v55_v12  ;;  %vm73_vm3 = vcmp.lt.s32.totalorder %v53_v11, 2  ;;  %vm74_vm4 = vcmp.lt.s32.totalorder %v53_v11, 3 }
  0x36   :  { %v59_v31 = vor.u32 %v58_v24, %v57_v14  ;;  %v62_v32 = vor.u32 %v61_v25, %v60_v16  ;;  %v65_v33 = vor.u32 %v64_v26, %v63_v18  ;;  %v247_v26 = vmul.f32 %v769_v1, %v769_v1 }
  0x37   :  { %v68_v34 = vor.u32 %v67_v27, %v66_v20  ;;  %v71_v35 = vor.u32 %v70_v29, %v69_v22 }
  0x38   :  { %v76_v36 = vsel %vm72_vm1, %v56_v23, %v59_v31  ;;  %v77_v37 = vsel %vm75_vm2, %v65_v33, 2102212464  ;;  %v80_v38 = vsel %vm72_vm1, %v59_v31, %v62_v32  ;;  %v84_v39 = vsel %vm72_vm1, %v62_v32, %v65_v33 }
  0x39   :  { %v78_v40 = vsel %vm74_vm4, %v62_v32, %v77_v37  ;;  %v81_v41 = vsel %vm75_vm2, %v68_v34, 920167782  ;;  %v85_v42 = vsel %vm75_vm2, %v71_v35, 1326507024 }
  0x3a   :  { %v82_v43 = vsel %vm74_vm4, %v65_v33, %v81_v41  ;;  %v86_v44 = vsel %vm74_vm4, %v68_v34, %v85_v42  ;;  %v79_v45 = vsel %vm73_vm3, %v76_v36, %v78_v40 }
  0x3b   :  { %v83_v46 = vsel %vm73_vm3, %v80_v38, %v82_v43  ;;  %v87_v47 = vsel %vm73_vm3, %v84_v39, %v86_v44  ;;  %v95_v52 = vmul.u32 %v88_v30, %v79_v45  ;;  %v250_v43 = vmul.f32 6.2831855, %v769_v1 }
  0x3c   :  { %v787_v48 = vmul.u32.u64.low %v88_v30, %v87_v47  ;;  %v788_v49 = vmul.u32.u64.high %v88_v30, %v87_v47, %v787_v48  ;;  %v790_v50 = vmul.u32.u64.low %v88_v30, %v83_v46  ;;  %v791_v51 = vmul.u32.u64.high %v88_v30, %v83_v46, %v790_v50 }
  0x3d   :  { %v725_v45 = vmov 0   ;;  %v726_v46 = vmov 1   ;;  %v727_v47 = vmov 4   ;;  %v728_v48 = vmov 2  }
  0x3e   :  { %vm97_vm5 = vc.u32 %v788_v49, %v790_v50  ;;  %v98_v53 = vadd.s32 1, %v791_v51  ;;  %v96_v0 = vadd.s32 %v790_v50, %v788_v49 }
  0x40   :  { %v99_v54 = vsel %vm97_vm5, %v98_v53, %v791_v51 }
  0x41   :  { %v100_v55 = vadd.s32 %v99_v54, %v95_v52  ;;  %v260_v54 = vlaneseq }
  0x43   :  { %v101_v56 = vadd.s32 536870912, %v100_v55 }
  0x45   :  { %v102_v57 = vshrl.u32 %v101_v56, 30 }
  0x47   :  { %v103_v58 = vshll.u32 %v102_v57, 30  ;;  %v126_v16 = vsub.s32 4, %v102_v57 }
  0x49   :  { %v104_v59 = vsub.s32 %v100_v55, %v103_v58  ;;  %v127_v22 = vsel %vm42_vm7, %v126_v16, %v102_v57  ;;  %v261_v55 = vshrl.u32 %v260_v54, 7  ;;  %v36_v58 = vld [vmem:[#allocation5] ss:$2 sm:$0x3] }
  0x4a   :  { %v129_v25 = vsel %vm41_vm8, 0, %v127_v22 }
  0x4b   :  { %v106_v60 = vsub.s32 0, %v104_v59  ;;  %v236_v27 = vadd.s32 3, %v129_v25  ;;  %v133_v30 = vand.u32 3, %v129_v25  ;;  %v262_v56 = vsub.s32 0, %v261_v55 }
  0x4c   :  { %v266_v57 = vsub.s32 1, %v261_v55 }
  0x4d   :  { %v573_v61 = vmin.u32 %v106_v60, %v104_v59  ;;  %v237_v29 = vand.u32 3, %v236_v27  ;;  %vm138_vm10 = vcmp.eq.s32.totalorder %v133_v30, 2  ;;  %vm135_vm12 = vcmp.eq.s32.totalorder %v133_v30, 0 }
  0x4e   :  { %vm134_vm14 = vcmp.lt.s32.totalorder %v133_v30, 2  ;;  %v263_v60 = vrot.slane %v36_v58, %v262_v56 }
  0x4f   :  { %v108_v62 = vclz %v573_v61  ;;  %vm242_vm9 = vcmp.eq.s32.totalorder %v237_v29, 2  ;;  %vm239_vm11 = vcmp.eq.s32.totalorder %v237_v29, 0  ;;  %vm238_vm13 = vcmp.lt.s32.totalorder %v237_v29, 2 }
  0x50   :  { %v267_v61 = vrot.slane %v36_v58, %v266_v57 }
  0x51   :  { %v574_v63 = vadd.s32 4294967294, %v108_v62 }
  0x53   :  { %vm575_vm6 = vcmp.lt.s32.totalorder %v574_v63, 0 }
  0x54   :  { %v111_v2 = vsel %vm575_vm6, 0, %v574_v63 }
  0x55   :  { %v112_v3 = vsub.s32 32, %v111_v2  ;;  %v113_v5 = vshll.u32 %v104_v59, %v111_v2  ;;  %v116_v6 = vsub.s32 4294967266, %v111_v2  ;;  %v38_v59 = vld [vmem:[#allocation5 + $0x1] ss:$2 sm:$0x3] }
  0x56   :  { %v285_v62 = vrot.slane %v38_v59, %v266_v57 }
  0x57   :  { %v114_v7 = vshrl.u32 %v96_v0, %v112_v3  ;;  %v117_v8 = vadd.s32 127, %v116_v6 }
  0x59   :  { %v115_v9 = vor.u32 %v114_v7, %v113_v5  ;;  %v118_v10 = vshll.u32 %v117_v8, 23 }
  0x5b   :  { %v119_v11 = vor.u32 4788187, %v118_v10  ;;  %v122_v12 = vcvt.s32.f32 %v115_v9 }
  0x5d   :  { %v120_v14 = vand.u32 2147483647, %v119_v11 }
  0x5f   :  { %v123_v18 = vmul.f32 %v122_v12, %v120_v14 }
  0x61   :  { %v124_v20 = vxor.u32 2147483648, %v123_v18 }
  0x63   :  { %v125_v23 = vsel %vm42_vm7, %v124_v20, %v123_v18 }
  0x64   :  { %v128_v24 = vsel %vm41_vm8, %v769_v1, %v125_v23 }
  0x65   :  { %623 = vcosq.f32 %v128_v24 }
  0x66   :  { %625 = vsinq.f32 %v128_v24 }
  0x67   :  { %627 = vrcp.f32 %v247_v26 }
  0x6f   :  { %v624_v31 = vpop.eup %623 }
  0x70   :  { %v626_v32 = vpop.eup %625  ;;  %v139_v4 = vxor.u32 2147483648, %v624_v31 }
  0x71   :  { %v136_v33 = vxor.u32 2147483648, %v626_v32  ;;  %v628_v38 = vpop.eup %627 }
  0x72   :  { %v244_v34 = vsel %vm242_vm9, %v139_v4, %v626_v32  ;;  %v140_v35 = vsel %vm138_vm10, %v139_v4, %v626_v32  ;;  %v249_v44 = vmul.f32 -0.5, %v628_v38 }
  0x73   :  { %v241_v36 = vsel %vm239_vm11, %v624_v31, %v136_v33  ;;  %v137_v37 = vsel %vm135_vm12, %v624_v31, %v136_v33 }
  0x74   :  { %v245_v39 = vsel %vm238_vm13, %v241_v36, %v244_v34  ;;  %v141_v40 = vsel %vm134_vm14, %v137_v37, %v140_v35 }
  0x75   :  { %v246_v41 = vsel %vm132_vm15, nan, %v245_v39  ;;  %v142_v42 = vsel %vm132_vm15, nan, %v141_v40 }
  0x76   :  { %290 = vperm.xlu1 %616, %v246_v41   ;;  %272 = vperm.xlu0 %615, %v142_v42  }
  0x7a   :  { %617 = vset.pattern.permute.xlu1 %v725_v45  ;;  %619 = vset.pattern.permute.xlu0 %v726_v46 }
  0x7b   :  { %335 = vperm.xlu1 %617, %v250_v43   ;;  %307 = vperm.xlu0 %619, %v249_v44  }
  0x7f   :  { %618 = vset.pattern.permute.xlu1 %v727_v47  ;;  %622 = vset.pattern.permute.xlu0 %v727_v47 }
  0x80   :  { %341 = vperm.xlu1 %618, %v769_v1   ;;  %v281_v1 = vrot.slane %v38_v59, %v262_v56 }
  0x84   :  { %620 = vset.pattern.permute.xlu1 %v728_v48 }
  0x85   :  { %315 = vperm.xlu1 %620, %v249_v44  }
  0x89   :  { %621 = vset.pattern.permute.xlu1 %v726_v46 }
  0x99   :  { %v253_v49 = vpop.permute.xlu0 %252 }
  0x9a   :  { %v255_v50 = vmul.f32 %v253_v49, %v250_v43 }
  0x9c   :  { %629 = vlog2.f32 %v255_v50 }
  0xa6   :  { %v630_v51 = vpop.eup %629 }
  0xa7   :  { %v257_v52 = vmul.f32 0.6931472, %v630_v51 }
  0xa9   :  { %v258_v53 = vsub.f32 0.0, %v257_v52 }
  0xab   :  { %324 = vperm.xlu1 %621, %v258_v53  }
  0xf5   :  { %v291_v63 = vpop.permute.xlu1 %290  ;;  %v273_v0 = vpop.permute.xlu0 %272 }
  0xf6   :  { %v299_v2 = vmul.f32 %v291_v63, %v263_v60  ;;  %v300_v3 = vmul.f32 %v291_v63, %v267_v61  ;;  %v297_v5 = vmul.f32 %v281_v1, %v273_v0  ;;  %v298_v6 = vmul.f32 %v285_v62, %v273_v0 }
  0xf7   :  { %v275_v7 = vmul.f32 %v273_v0, %v263_v60  ;;  %v276_v8 = vmul.f32 %v273_v0, %v267_v61  ;;  %v293_v9 = vmul.f32 %v291_v63, %v281_v1  ;;  %v294_v10 = vmul.f32 %v291_v63, %v285_v62 }
  0xf8   :  { %v301_v11 = vsub.f32 %v297_v5, %v299_v2  ;;  %v302_v12 = vsub.f32 %v298_v6, %v300_v3 }
  0xf9   :  { %v295_v16 = vadd.f32 %v293_v9, %v275_v7  ;;  %v296_v18 = vadd.f32 %v294_v10, %v276_v8 }
  0xfa   :  { %v336_v14 = vpop.permute.xlu1 %335  ;;  %v308_v27 = vpop.permute.xlu0 %307  ;;  %v312_v4 = vmul.f32 %v301_v11, %v301_v11  ;;  %v313_v36 = vmul.f32 %v302_v12, %v302_v12 }
  0xfb   :  { %v338_v20 = vmul.f32 %v336_v14, %v295_v16  ;;  %v339_v22 = vmul.f32 %v336_v14, %v296_v18  ;;  %v303_v24 = vmul.f32 %v295_v16, %v295_v16  ;;  %v304_v29 = vmul.f32 %v296_v18, %v296_v18 }
  0xfd   :  { %v310_v33 = vmul.f32 %v308_v27, %v303_v24  ;;  %v311_v41 = vmul.f32 %v308_v27, %v304_v29 }
  0xff   :  { %v342_v23 = vpop.permute.xlu1 %341 }
 0x100   :  { %v806_v25 = vadd.f32 %v342_v23, %v338_v20  ;;  %v808_v26 = vadd.f32 %v342_v23, %v339_v22 }
 0x102   :  { %v346_v30 = vand.u32 2147483647, %v806_v25  ;;  %v349_v31 = vand.u32 2139095040, %v806_v25  ;;  %v452_v32 = vand.u32 2139095040, %v808_v26  ;;  %v449_v38 = vand.u32 2147483647, %v808_v26 }
 0x103   :  { %vm348_vm14 = vcmp.lt.s32.totalorder %v806_v25, 0 }
 0x104   :  { %v350_v34 = vshrl.u32 %v349_v31, 23  ;;  %v316_v35 = vpop.permute.xlu1 %315  ;;  %v353_v37 = vand.u32 8388607, %v346_v30  ;;  %v453_v39 = vshrl.u32 %v452_v32, 23  ;;  %v456_v49 = vand.u32 8388607, %v449_v38 }
 0x105   :  { %v318_v40 = vmul.f32 %v316_v35, %v312_v4  ;;  %v319_v43 = vmul.f32 %v316_v35, %v313_v36  ;;  %vm887_vm15 = vcmp.le.f32.partialorder %v346_v30, 0.7853982 }
 0x106   :  { %v580_v42 = vadd.s32 4294967169, %v350_v34  ;;  %v584_v44 = vadd.s32 4294967169, %v453_v39  ;;  %v354_v48 = vor.u32 8388608, %v353_v37  ;;  %v457_v56 = vor.u32 8388608, %v456_v49 }
 0x107   :  { %v816_v45 = vadd.f32 %v318_v40, %v310_v33  ;;  %v818_v47 = vadd.f32 %v319_v43, %v311_v41 }
 0x108   :  { %v356_v46 = vadd.s32 1, %v580_v42  ;;  %v459_v50 = vadd.s32 1, %v584_v44  ;;  %v822_v55 = vshll.u32 %v354_v48, 8 }
 0x10a   :  { %vm357_vm0 = vcmp.gt.s32.totalorder %v356_v46, 0  ;;  %vm460_vm1 = vcmp.gt.s32.totalorder %v459_v50, 0 }
 0x10b   :  { %v358_v51 = vsel %vm357_vm0, %v356_v46, 0  ;;  %v461_v54 = vsel %vm460_vm1, %v459_v50, 0  ;;  %vm451_vm0 = vcmp.lt.s32.totalorder %v808_v26, 0  ;;  %vm900_vm1 = vcmp.le.f32.partialorder %v449_v38, 0.7853982 }
 0x10c   :  { %v359_v52 = vshrl.u32 %v358_v51, 5  ;;  %v360_v53 = vand.u32 31, %v358_v51  ;;  %v825_v59 = vshrl.u32 %v461_v54, 5  ;;  %v463_v60 = vand.u32 31, %v461_v54 }
 0x10d   :  { %v497_v51 = vshll.u32 %v457_v56, 8 }
 0x10e   :  { %v361_v57 = vsub.s32 32, %v360_v53  ;;  %v363_v58 = vshll.u32 %v719_v13, %v360_v53  ;;  %v366_v61 = vshll.u32 %v720_v15, %v360_v53  ;;  %v369_v1 = vshll.u32 %v721_v17, %v360_v53 }
 0x10f   :  { %v372_v62 = vshll.u32 %v722_v19, %v360_v53  ;;  %v375_v63 = vshll.u32 %v723_v21, %v360_v53  ;;  %vm378_vm2 = vcmp.lt.s32.totalorder %v359_v52, 1  ;;  %vm379_vm3 = vcmp.lt.s32.totalorder %v359_v52, 2 }
 0x110   :  { %v364_v0 = vshrl.u32 %v720_v15, %v361_v57  ;;  %v367_v2 = vshrl.u32 %v721_v17, %v361_v57  ;;  %v370_v3 = vshrl.u32 %v722_v19, %v361_v57  ;;  %v362_v5 = vshrl.u32 %v719_v13, %v361_v57 }
 0x111   :  { %v373_v6 = vshrl.u32 %v723_v21, %v361_v57  ;;  %v376_v7 = vshrl.u32 %v724_v28, %v361_v57  ;;  %v464_v11 = vsub.s32 32, %v463_v60  ;;  %vm380_vm4 = vcmp.lt.s32.totalorder %v359_v52, 3 }
 0x112   :  { %v365_v8 = vor.u32 %v364_v0, %v363_v58  ;;  %v368_v9 = vor.u32 %v367_v2, %v366_v61  ;;  %v371_v10 = vor.u32 %v370_v3, %v369_v1  ;;  %vm381_vm5 = vcmp.lt.s32.totalorder %v359_v52, 4 }
 0x113   :  { %v374_v12 = vor.u32 %v373_v6, %v372_v62  ;;  %v377_v14 = vor.u32 %v376_v7, %v375_v63  ;;  %v466_v29 = vshll.u32 %v719_v13, %v463_v60  ;;  %v467_v4 = vshrl.u32 %v720_v15, %v464_v11 }
 0x114   :  { %v382_v16 = vsel %vm378_vm2, %v362_v5, %v365_v8  ;;  %v383_v18 = vsel %vm381_vm5, %v371_v10, 2102212464  ;;  %v386_v20 = vsel %vm378_vm2, %v365_v8, %v368_v9  ;;  %v390_v22 = vsel %vm378_vm2, %v368_v9, %v371_v10 }
 0x115   :  { %v384_v23 = vsel %vm380_vm4, %v368_v9, %v383_v18  ;;  %v387_v24 = vsel %vm381_vm5, %v374_v12, 920167782  ;;  %v391_v27 = vsel %vm381_vm5, %v377_v14, 1326507024  ;;  %v469_v33 = vshll.u32 %v720_v15, %v463_v60 }
 0x116   :  { %v388_v31 = vsel %vm380_vm4, %v371_v10, %v387_v24  ;;  %v392_v32 = vsel %vm380_vm4, %v374_v12, %v391_v27  ;;  %v385_v34 = vsel %vm379_vm3, %v382_v16, %v384_v23  ;;  %v470_v37 = vshrl.u32 %v721_v17, %v464_v11 }
 0x117   :  { %v389_v35 = vsel %vm379_vm3, %v386_v20, %v388_v31  ;;  %v393_v36 = vsel %vm379_vm3, %v390_v22, %v392_v32  ;;  %v468_v43 = vor.u32 %v467_v4, %v466_v29  ;;  %v472_v15 = vshll.u32 %v721_v17, %v463_v60 }
 0x118   :  { %v848_v39 = vmul.u32.u64.low %v822_v55, %v393_v36  ;;  %v849_v40 = vmul.u32.u64.high %v822_v55, %v393_v36, %v848_v39  ;;  %v852_v41 = vmul.u32.u64.low %v822_v55, %v389_v35  ;;  %v853_v42 = vmul.u32.u64.high %v822_v55, %v389_v35, %v852_v41 }
 0x119   :  { %v471_v44 = vor.u32 %v470_v37, %v469_v33  ;;  %v473_v46 = vshrl.u32 %v722_v19, %v464_v11  ;;  %v475_v48 = vshll.u32 %v722_v19, %v463_v60  ;;  %v476_v49 = vshrl.u32 %v723_v21, %v464_v11 }
 0x11a   :  { %v479_v50 = vshrl.u32 %v724_v28, %v464_v11  ;;  %v401_v52 = vmul.u32 %v822_v55, %v385_v34  ;;  %v465_v53 = vshrl.u32 %v719_v13, %v464_v11  ;;  %v478_v57 = vshll.u32 %v723_v21, %v463_v60 }
 0x11b   :  { %v474_v54 = vor.u32 %v473_v46, %v472_v15  ;;  %vm403_vm6 = vc.u32 %v849_v40, %v852_v41  ;;  %v404_v17 = vadd.s32 1, %v853_v42  ;;  %v477_v58 = vor.u32 %v476_v49, %v475_v48 }
 0x11c   :  { %vm481_vm7 = vcmp.lt.s32.totalorder %v825_v59, 1  ;;  %v480_v19 = vor.u32 %v479_v50, %v478_v57  ;;  %vm483_vm8 = vcmp.lt.s32.totalorder %v825_v59, 3  ;;  %vm484_vm9 = vcmp.lt.s32.totalorder %v825_v59, 4 }
 0x11d   :  { %v489_v28 = vsel %vm481_vm7, %v468_v43, %v471_v44  ;;  %v405_v55 = vsel %vm403_vm6, %v404_v17, %v853_v42  ;;  %v486_v56 = vsel %vm484_vm9, %v474_v54, 2102212464  ;;  %v490_v13 = vsel %vm484_vm9, %v477_v58, 920167782 }
 0x11e   :  { %v493_v61 = vsel %vm481_vm7, %v471_v44, %v474_v54  ;;  %v406_v1 = vadd.s32 %v405_v55, %v401_v52  ;;  %vm482_vm10 = vcmp.lt.s32.totalorder %v825_v59, 2  ;;  %v491_v21 = vsel %vm483_vm8, %v474_v54, %v490_v13 }
 0x11f   :  { %v494_v60 = vsel %vm484_vm9, %v480_v19, 1326507024  ;;  %v485_v62 = vsel %vm481_vm7, %v465_v53, %v468_v43  ;;  %v487_v63 = vsel %vm483_vm8, %v471_v44, %v486_v56  ;;  %v492_v0 = vsel %vm482_vm10, %v489_v28, %v491_v21 }
 0x120   :  { %v495_v2 = vsel %vm483_vm8, %v477_v58, %v494_v60  ;;  %v407_v3 = vadd.s32 536870912, %v406_v1  ;;  %v870_v6 = vmul.u32.u64.low %v497_v51, %v492_v0  ;;  %v871_v7 = vmul.u32.u64.high %v497_v51, %v492_v0, %v870_v6 }
 0x121   :  { %v496_v5 = vsel %vm482_vm10, %v493_v61, %v495_v2  ;;  %v488_v11 = vsel %vm482_vm10, %v485_v62, %v487_v63  ;;  %v402_v35 = vadd.s32 %v852_v41, %v849_v40  ;;  %vm438_vm5 = vweird.f32 %v806_v25 }
 0x122   :  { %v873_v8 = vmul.u32.u64.low %v497_v51, %v496_v5  ;;  %v874_v9 = vmul.u32.u64.high %v497_v51, %v496_v5, %v873_v8  ;;  %v408_v10 = vshrl.u32 %v407_v3, 30  ;;  %v507_v14 = vadd.s32 1, %v871_v7 }
 0x123   :  { %v504_v59 = vmul.u32 %v497_v51, %v488_v11  ;;  %vm541_vm9 = vweird.f32 %v808_v26 }
 0x124   :  { %v409_v12 = vshll.u32 %v408_v10, 30  ;;  %vm506_vm11 = vc.u32 %v874_v9, %v870_v6  ;;  %v505_v54 = vadd.s32 %v870_v6, %v874_v9  ;;  %v432_v60 = vsub.s32 4, %v408_v10 }
 0x125   :  { %v508_v18 = vsel %vm506_vm11, %v507_v14, %v871_v7 }
 0x126   :  { %v410_v16 = vsub.s32 %v406_v1, %v409_v12  ;;  %v509_v20 = vadd.s32 %v508_v18, %v504_v59  ;;  %v433_v5 = vsel %vm348_vm14, %v432_v60, %v408_v10 }
 0x127   :  { %v435_v7 = vsel %vm887_vm15, 0, %v433_v5 }
 0x128   :  { %v412_v22 = vsub.s32 0, %v410_v16  ;;  %v510_v23 = vadd.s32 536870912, %v509_v20  ;;  %v439_v12 = vand.u32 3, %v435_v7 }
 0x12a   :  { %v581_v24 = vmin.u32 %v412_v22, %v410_v16  ;;  %v879_v27 = vshrl.u32 %v510_v23, 30  ;;  %v325_v28 = vpop.permute.xlu1 %324  ;;  %vm444_vm2 = vcmp.eq.s32.totalorder %v439_v12, 2  ;;  %vm441_vm3 = vcmp.eq.s32.totalorder %v439_v12, 0 }
 0x12b   :  { %v327_v21 = vadd.f32 %v325_v28, %v816_v45  ;;  %v328_v9 = vadd.f32 %v325_v28, %v818_v47  ;;  %vm440_vm4 = vcmp.lt.s32.totalorder %v439_v12, 2 }
 0x12c   :  { %v414_v29 = vclz %v581_v24  ;;  %v512_v31 = vshll.u32 %v879_v27, 30  ;;  %v535_v11 = vsub.s32 4, %v879_v27 }
 0x12d   :  { %v329_v3 = vmul.f32 1.442695, %v327_v21 }
 0x12e   :  { %v582_v32 = vadd.s32 4294967294, %v414_v29  ;;  %v513_v4 = vsub.s32 %v509_v20, %v512_v31  ;;  %v536_v38 = vsel %vm451_vm0, %v535_v11, %v879_v27 }
 0x12f   :  { %v538_v23 = vsel %vm900_vm1, 0, %v536_v38 }
 0x130   :  { %vm583_vm12 = vcmp.lt.s32.totalorder %v582_v32, 0  ;;  %v515_v34 = vsub.s32 0, %v513_v4 }
 0x131   :  { %v417_v33 = vsel %vm583_vm12, 0, %v582_v32  ;;  %v542_v32 = vand.u32 3, %v538_v23 }
 0x132   :  { %v418_v36 = vsub.s32 32, %v417_v33  ;;  %v422_v37 = vsub.s32 4294967266, %v417_v33  ;;  %v585_v39 = vmin.u32 %v515_v34, %v513_v4  ;;  %v419_v42 = vshll.u32 %v410_v16, %v417_v33 }
 0x133   :  { %v331_v16 = vmul.f32 1.442695, %v328_v9  ;;  %vm547_vm6 = vcmp.eq.s32.totalorder %v542_v32, 2  ;;  %vm544_vm7 = vcmp.eq.s32.totalorder %v542_v32, 0  ;;  %vm543_vm8 = vcmp.lt.s32.totalorder %v542_v32, 2 }
 0x134   :  { %v420_v43 = vshrl.u32 %v402_v35, %v418_v36  ;;  %v423_v44 = vadd.s32 127, %v422_v37  ;;  %v517_v15 = vclz %v585_v39 }
 0x136   :  { %v421_v46 = vor.u32 %v420_v43, %v419_v42  ;;  %v424_v48 = vshll.u32 %v423_v44, 23  ;;  %v586_v49 = vadd.s32 4294967294, %v517_v15 }
 0x138   :  { %v425_v50 = vor.u32 4788187, %v424_v48  ;;  %vm587_vm13 = vcmp.lt.s32.totalorder %v586_v49, 0  ;;  %v428_v52 = vcvt.s32.f32 %v421_v46 }
 0x139   :  { %v520_v53 = vsel %vm587_vm13, 0, %v586_v49 }
 0x13a   :  { %v426_v51 = vand.u32 2147483647, %v425_v50  ;;  %v521_v57 = vsub.s32 32, %v520_v53  ;;  %v525_v17 = vsub.s32 4294967266, %v520_v53  ;;  %v522_v41 = vshll.u32 %v513_v4, %v520_v53 }
 0x13c   :  { %v429_v40 = vmul.f32 %v428_v52, %v426_v51  ;;  %v523_v58 = vshrl.u32 %v505_v54, %v521_v57  ;;  %v526_v19 = vadd.s32 127, %v525_v17 }
 0x13e   :  { %v430_v55 = vxor.u32 2147483648, %v429_v40  ;;  %v524_v56 = vor.u32 %v523_v58, %v522_v41  ;;  %v527_v13 = vshll.u32 %v526_v19, 23 }
 0x140   :  { %v431_v1 = vsel %vm348_vm14, %v430_v55, %v429_v40  ;;  %v528_v63 = vor.u32 4788187, %v527_v13  ;;  %v531_v2 = vcvt.s32.f32 %v524_v56 }
 0x141   :  { %v434_v62 = vsel %vm887_vm15, %v806_v25, %v431_v1 }
 0x142   :  { %631 = vcosq.f32 %v434_v62  ;;  %v529_v0 = vand.u32 2147483647, %v528_v63 }
 0x143   :  { %633 = vsinq.f32 %v434_v62 }
 0x144   :  { %v532_v6 = vmul.f32 %v531_v2, %v529_v0  ;;  %635 = vpow2.f32 %v329_v3 }
 0x146   :  { %v533_v30 = vxor.u32 2147483648, %v532_v6 }
 0x148   :  { %v534_v8 = vsel %vm451_vm0, %v533_v30, %v532_v6 }
 0x149   :  { %v537_v10 = vsel %vm900_vm1, %v808_v26, %v534_v8 }
 0x14a   :  { %637 = vcosq.f32 %v537_v10 }
 0x14b   :  { %639 = vsinq.f32 %v537_v10 }
 0x14c   :  { %v632_v14 = vpop.eup %631  ;;  %641 = vpow2.f32 %v331_v16 }
 0x14d   :  { %v634_v59 = vpop.eup %633  ;;  %v445_v18 = vxor.u32 2147483648, %v632_v14 }
 0x14e   :  { %v442_v20 = vxor.u32 2147483648, %v634_v59  ;;  %v636_v29 = vpop.eup %635 }
 0x14f   :  { %v446_v22 = vsel %vm444_vm2, %v445_v18, %v634_v59 }
 0x150   :  { %v443_v47 = vsel %vm441_vm3, %v632_v14, %v442_v20 }
 0x151   :  { %v447_v24 = vsel %vm440_vm4, %v443_v47, %v446_v22 }
 0x152   :  { %v448_v31 = vsel %vm438_vm5, nan, %v447_v24 }
 0x153   :  { %v552_v4 = vmul.f32 %v636_v29, %v448_v31 }
 0x154   :  { %v638_v33 = vpop.eup %637 }
 0x155   :  { %554 = vst [vmem:[#allocation7] sm:$0xff] %v552_v4  ;;  %v640_v27 = vpop.eup %639  ;;  %v548_v34 = vxor.u32 2147483648, %v638_v33 }
 0x156   :  { %v545_v35 = vxor.u32 2147483648, %v640_v27  ;;  %v642_v39 = vpop.eup %641 }
 0x157   :  { %v549_v36 = vsel %vm547_vm6, %v548_v34, %v640_v27 }
 0x158   :  { %v546_v37 = vsel %vm544_vm7, %v638_v33, %v545_v35 }
 0x159   :  { %v550_v25 = vsel %vm543_vm8, %v546_v37, %v549_v36 }
 0x15a   :  { %v551_v42 = vsel %vm541_vm9, nan, %v550_v25 }
 0x15b   :  { %v553_v43 = vmul.f32 %v642_v39, %v551_v42 }
 0x15d   :  { %555 = vst [vmem:[#allocation7 + $0x8] sm:$0xff] %v553_v43 }
 0x15e   :  { %698 = shalt.err (!%p695_p6)
}
 0x15f   :  { %s699_s9 = scalar_lea.hbm %s928_s2, 256 }
 0x160   :  { %p700_p7 = scmp.ne.s32.totalorder %s928_s2, %s699_s9  ;;  %p703_p8 = scmp.lt.u32.totalorder %s699_s9, %s928_s2 }
 0x162   :  { %p705_p9 = pnand %p703_p8, %p700_p7 }
 0x164   :  { %708 = shalt.err (!%p705_p9)
}
 0x165   :  { %565 = dma.vmem_to_hbm [thread:$0]  %s563_s5, 256, %s928_s2, [#allocation4]  }
 0x166   :  { %713 = dma.done.wait [#allocation4], 256  }
 0x167   :  { %714 = vsyncadd [#allocation4], 4294967040 }
 0x168   :  { %569 = vsyncpa [#allocation3], 1 }
 0x169   :  { %570 = vsyncpa [#allocation6], 1 }
 0x16a   :  { %571 = vsyncpa [#allocation4], 1 }

</bundles_post_ra>
